<compile_context>
chip_gen: v7x
topology: tpu7x:2x2x1
jax: 0.10.0
libtpu: 0.0.40
codegen_flags: <defaults>
</compile_context>

<pallas_src>
import functools

import jax
import jax.numpy as jnp
from jax.experimental import pallas as pl
from jax.experimental.pallas import tpu as pltpu


def _round_up(x: int, m: int) -> int:
    return ((x + m - 1) // m) * m


def _gelu_exact(y):
    # torch.nn.GELU default (approximate='none'): 0.5*y*(1 + erf(y/sqrt(2)))
    inv_sqrt2 = jnp.float32(0.7071067811865476)
    return 0.5 * y * (1.0 + jax.lax.erf(y * inv_sqrt2))


def _mapper_kernel(x_ref, w_ref, b_ref, o_ref, acc_ref, *, nk):
    # x_ref: (tm, tk), w_ref: (tk, tn), b_ref: (1, tn)
    # o_ref: (tm, tn), acc_ref: (tm, tn) f32 VMEM scratch
    # nk: static number of K steps (grid[2]).
    k = pl.program_id(2)

    partial = jnp.dot(
        x_ref[...], w_ref[...], preferred_element_type=jnp.float32
    )

    if nk == 1:
        # Single K step: no accumulator traffic at all.
        o_ref[...] = _gelu_exact(partial + b_ref[...]).astype(o_ref.dtype)
    else:
        @pl.when(k == 0)
        def _():
            # Overwrite instead of zero-init + '+=' (saves a full (tm,tn)
            # f32 store + load on the first step).
            acc_ref[...] = partial

        @pl.when(jnp.logical_and(k > 0, k < nk - 1))
        def _():
            acc_ref[...] += partial

        @pl.when(k == nk - 1)
        def _():
            # Fold the last partial product, bias and GELU into the epilogue
            # without re-writing the accumulator.
            y = acc_ref[...] + partial + b_ref[...]
            o_ref[...] = _gelu_exact(y).astype(o_ref.dtype)


@functools.partial(jax.jit, static_argnames=("tm", "tn", "tk"))
def simple_mapper(x, w, b, *, tm=512, tn=1024, tk=512):
    """y = GELU(x @ w + b), exact-erf GELU.

    x: [B, IN] f32, w: [IN, OUT] f32 (PyTorch weight^T), b: [OUT] f32
    returns [B, OUT] f32.
    """
    B, IN = x.shape
    OUT = w.shape[1]

    # Clamp tile sizes for small problems; keep (8, 128) divisibility.
    tm = min(tm, _round_up(B, 8))
    tn = min(tn, _round_up(OUT, 128))
    tk = min(tk, _round_up(IN, 128))

    gm = pl.cdiv(B, tm)
    gn = pl.cdiv(OUT, tn)

    # v7x megacore guard: make sure at least one 'parallel' axis has >= 2
    # blocks so the second TensorCore isn't idle on small problems.
    if gm == 1 and gn == 1:
        if tn >= 256:
            tn //= 2
        elif tm >= 16:
            tm //= 2
        gm = pl.cdiv(B, tm)
        gn = pl.cdiv(OUT, tn)

    # Only the reduction axis needs zero padding (garbage in a partial K block
    # would corrupt the accumulation). Ragged M/N edges are safe: garbage only
    # reaches output rows/cols that Pallas never writes back.
    Kp = _round_up(IN, tk)
    if Kp != IN:
        x = jnp.pad(x, ((0, 0), (0, Kp - IN)))
        w = jnp.pad(w, ((0, Kp - IN), (0, 0)))
    gk = Kp // tk

    b2 = b.reshape(1, OUT)

    Mp, Np = gm * tm, gn * tn
    cost = pl.CostEstimate(
        flops=2 * Mp * Kp * Np,
        transcendentals=Mp * Np,  # one erf per output element
        # X is re-streamed once per N pass, W once per M pass.
        bytes_accessed=4 * (gn * Mp * Kp + gm * Kp * Np + Mp * Np + Np),
    )

    return pl.pallas_call(
        functools.partial(_mapper_kernel, nk=gk),
        out_shape=jax.ShapeDtypeStruct((B, OUT), x.dtype),
        grid=(gm, gn, gk),
        in_specs=[
            pl.BlockSpec((tm, tk), lambda i, j, k: (i, k)),
            pl.BlockSpec((tk, tn), lambda i, j, k: (k, j)),
            pl.BlockSpec((1, tn), lambda i, j, k: (0, j)),
        ],
        out_specs=pl.BlockSpec((tm, tn), lambda i, j, k: (i, j)),
        scratch_shapes=[pltpu.VMEM((tm, tn), jnp.float32)],
        compiler_params=pltpu.CompilerParams(
            dimension_semantics=("parallel", "parallel", "arbitrary"),
            # Default tiles use ~12 MiB; 32 MiB covers larger user tiles and is
            # safely below every generation's physical VMEM (64 MiB on v7x).
            vmem_limit_bytes=32 * 1024 * 1024,
        ),
        cost_estimate=cost,
    )(x, w, b2)


def _gelu_ref(y):
    return 0.5 * y * (1.0 + jax.lax.erf(y * jnp.float32(0.7071067811865476)))


if __name__ == "__main__":
    key = jax.random.PRNGKey(0)

    def make_case(key, B, IN, OUT):
        kx, kw, kb = jax.random.split(key, 3)
        x = jax.random.normal(kx, (B, IN), dtype=jnp.float32)
        bound = 1.0 / jnp.sqrt(jnp.float32(IN))
        w = jax.random.uniform(kw, (IN, OUT), dtype=jnp.float32,
                               minval=-bound, maxval=bound)
        b = jax.random.uniform(kb, (OUT,), dtype=jnp.float32,
                               minval=-bound, maxval=bound)
        return x, w, b

    ok = True

    # Case 1: tiny module-scale shapes (batch=8, input_size=32, output_size=64).
    # Exercises the single-K-step (no accumulator) path and blocks larger than
    # the array along N.
    k1, k2 = jax.random.split(key)
    x, w, b = make_case(k1, 8, 32, 64)
    out = jax.block_until_ready(simple_mapper(x, w, b))
    ref = _gelu_ref(x @ w + b)
    ok &= out.shape == (8, 64)
    ok &= bool(jnp.allclose(out, ref, atol=1e-5, rtol=1e-5))

    # Case 2: multi-tile grid with a K reduction and ragged (unpadded) M/N
    # edges -> exercises the accumulator path and partial edge blocks.
    x, w, b = make_case(k2, 200, 384, 320)
    out = jax.block_until_ready(simple_mapper(x, w, b, tm=64, tn=128, tk=128))
    ref = _gelu_ref(x @ w + b)
    ok &= out.shape == (200, 320)
    ok &= bool(jnp.allclose(out, ref, atol=1e-4, rtol=1e-4))

    assert ok
    print("KERNEL_OK")
</pallas_src>

<mosaic_0001>
module attributes {stable_mosaic.version = 11 : i64} {
  func.func @_mapper_kernel(%arg0: i32, %arg1: i32, %arg2: i32, %arg3: memref<8x128xf32, #tpu.memory_space<vmem>>, %arg4: memref<128x128xf32, #tpu.memory_space<vmem>>, %arg5: memref<1x128xf32, #tpu.memory_space<vmem>>, %arg6: memref<8x128xf32, #tpu.memory_space<vmem>>, %arg7: memref<8x128xf32, #tpu.memory_space<vmem>>) attributes {dimension_semantics = [#tpu.dimension_semantics<parallel>, #tpu.dimension_semantics<parallel>, #tpu.dimension_semantics<arbitrary>], iteration_bounds = array<i64: 1, 1, 1>, scalar_prefetch = 0 : i64, scratch_operands = 1 : i64, tpu.core_type = #tpu.core_type<tc>, window_params = [{transform_indices = @transform_0, window_bounds = array<i64: 8, 128>}, {transform_indices = @transform_1, window_bounds = array<i64: 128, 128>}, {transform_indices = @transform_2, window_bounds = array<i64: 1, 128>}, {transform_indices = @transform_3, window_bounds = array<i64: 8, 128>}]} {
    %c0 = arith.constant 0 : index
    %c0_0 = arith.constant 0 : index
    %0 = vector.load %arg3[%c0, %c0_0] : memref<8x128xf32, #tpu.memory_space<vmem>>, vector<8x128xf32>
    %c0_1 = arith.constant 0 : index
    %c0_2 = arith.constant 0 : index
    %1 = vector.load %arg4[%c0_1, %c0_2] : memref<128x128xf32, #tpu.memory_space<vmem>>, vector<128x128xf32>
    %cst = arith.constant dense<0.000000e+00> : vector<8x128xf32>
    %2 = tpu.matmul %0, %1, %cst {dimension_numbers = #tpu.dot_dimension_numbers<[1], [0], [0], [1], [0, 0, 1, 1], [], []>} : vector<8x128xf32>, vector<128x128xf32>, vector<8x128xf32> -> vector<8x128xf32>
    %c0_3 = arith.constant 0 : index
    %c0_4 = arith.constant 0 : index
    %3 = vector.load %arg5[%c0_3, %c0_4] : memref<1x128xf32, #tpu.memory_space<vmem>>, vector<1x128xf32>
    %4 = vector.broadcast %3 : vector<1x128xf32> to vector<8x128xf32>
    %5 = arith.addf %2, %4 : vector<8x128xf32>
    %cst_5 = arith.constant 5.000000e-01 : f32
    %6 = vector.broadcast %cst_5 : f32 to vector<8x128xf32>
    %7 = arith.mulf %6, %5 : vector<8x128xf32>
    %cst_6 = arith.constant 0.707106769 : f32
    %8 = vector.broadcast %cst_6 : f32 to vector<8x128xf32>
    %9 = arith.mulf %5, %8 : vector<8x128xf32>
    %10 = math.erf %9 : vector<8x128xf32>
    %cst_7 = arith.constant 1.000000e+00 : f32
    %11 = vector.broadcast %cst_7 : f32 to vector<8x128xf32>
    %12 = arith.addf %11, %10 : vector<8x128xf32>
    %13 = arith.mulf %7, %12 : vector<8x128xf32>
    %c0_8 = arith.constant 0 : index
    %c0_9 = arith.constant 0 : index
    %14 = vector.load %arg6[%c0_8, %c0_9] : memref<8x128xf32, #tpu.memory_space<vmem>>, vector<8x128xf32>
    tpu.vector_store %arg6[%c0_8, %c0_9], %13 {strides = array<i32>} : memref<8x128xf32, #tpu.memory_space<vmem>>, vector<8x128xf32>,
    return
  }
  func.func @transform_0(%arg0: i32, %arg1: i32, %arg2: i32) -> (i32, i32) {
    %c0_i32 = arith.constant 0 : i32
    return %arg0, %arg2 : i32, i32
  }
  func.func @transform_1(%arg0: i32, %arg1: i32, %arg2: i32) -> (i32, i32) {
    %c0_i32 = arith.constant 0 : i32
    return %arg2, %arg1 : i32, i32
  }
  func.func @transform_2(%arg0: i32, %arg1: i32, %arg2: i32) -> (i32, i32) {
    %c0_i32 = arith.constant 0 : i32
    %c0_i32_0 = arith.constant 0 : i32
    return %c0_i32, %arg1 : i32, i32
  }
  func.func @transform_3(%arg0: i32, %arg1: i32, %arg2: i32) -> (i32, i32) {
    %c0_i32 = arith.constant 0 : i32
    return %arg0, %arg1 : i32, i32
  }
}

</mosaic_0001>

<bundles_post_ra>
// kernel: simple_mapper.1
= control target key start
LH: loop header
LB: loop body
LE: loop exit
PB: predicated region body
PF: predicated region fallthrough
CT: control target
= control target key end

     0   :  { %v236_v3 = vmov 0.0|0.0   ;;  %vm237_vm0 = vmmov 0   ;;  %v238_v6 = vmov 0.0   ;;  %s326_s0 = inlined_call_operand.vmem [shape: f32[8,128], index: 0, kind: input, shape index: {}]   ;;  %s327_s1 = inlined_call_operand.vmem [shape: f32[128,64], index: 1, kind: input, shape index: {}]   ;;  %s328_s2 = inlined_call_operand.vmem [shape: f32[1,64], index: 2, kind: input, shape index: {}]   ;;  %s329_s3 = inlined_call_operand.hbm [shape: f32[8,64], index: 3, kind: output, shape index: {}]  }
   0x1   :  { %v16_v0 = vld [vmem:[%s327_s1] sm:$0xff]  ;;  %v17_v1 = vld [vmem:[%s327_s1 + $0x8] sm:$0xff]  ;;  %v18_v2 = vld [vmem:[%s327_s1 + $0x10] sm:$0xff]  ;;  %182 = vmatprep.subr.bf16.mxu0 %v236_v3  ;;  %179 = vmatprep.mubr.msk.f32.mxu0 %vm237_vm0, %v238_v6 }
   0x2   :  { %v183_v4 = vpack.c.bf16 %v17_v1, %v16_v0  ;;  %v19_v5 = vld [vmem:[%s327_s1 + $0x18] sm:$0xff]  ;;  %v20_v8 = vld [vmem:[%s327_s1 + $0x20] sm:$0xff]  ;;  %v21_v9 = vld [vmem:[%s327_s1 + $0x28] sm:$0xff] }
   0x3   :  { %v186_v7 = vpack.c.bf16 %v19_v5, %v18_v2 }
   0x4   :  { %184 = vmatpush3.bf16.msra.mxu0 %v183_v4 }
   0x5   :  { %185 = vmatprep.subr.bf16.mxu0 %v236_v3 }
   0x6   :  { %8 = vsyncpa [#allocation4], 0  ;;  %v189_v10 = vpack.c.bf16 %v21_v9, %v20_v8  ;;  %v22_v11 = vld [vmem:[%s327_s1 + $0x30] sm:$0xff]  ;;  %v23_v12 = vld [vmem:[%s327_s1 + $0x38] sm:$0xff] }
   0x7   :  { %v192_v13 = vpack.c.bf16 %v23_v12, %v22_v11  ;;  %v24_v14 = vld [vmem:[%s327_s1 + $0x40] sm:$0xff]  ;;  %v25_v15 = vld [vmem:[%s327_s1 + $0x48] sm:$0xff]  ;;  %v26_v17 = vld [vmem:[%s327_s1 + $0x50] sm:$0xff] }
   0x8   :  { %187 = vmatpush3.bf16.msra.mxu0 %v186_v7  ;;  %v195_v16 = vpack.c.bf16 %v25_v15, %v24_v14  ;;  %v27_v18 = vld [vmem:[%s327_s1 + $0x58] sm:$0xff]  ;;  %v28_v20 = vld [vmem:[%s327_s1 + $0x60] sm:$0xff]  ;;  %v29_v21 = vld [vmem:[%s327_s1 + $0x68] sm:$0xff] }
   0x9   :  { %188 = vmatprep.subr.bf16.mxu0 %v236_v3  ;;  %v198_v19 = vpack.c.bf16 %v27_v18, %v26_v17  ;;  %v201_v22 = vpack.c.bf16 %v29_v21, %v28_v20  ;;  %v30_v23 = vld [vmem:[%s327_s1 + $0x70] sm:$0xff]  ;;  %v31_v24 = vld [vmem:[%s327_s1 + $0x78] sm:$0xff]  ;;  %v15_v26 = vld [vmem:[%s326_s0] sm:$0xff]  ;;  %s239_s1 = smov [#allocation3]  }
   0xa   :  { %v204_v25 = vpack.c.bf16 %v31_v24, %v30_v23  ;;  %v129_v27 = vld [vmem:[%s328_s2] ss:$0 sm:$0xff]  ;;  %s121_s21 = sshll.u32 %s239_s1, 4  ;;  %s122_s21 = int_to_ptr.vmem [resolvable:$true] %s121_s21 }
   0xb   :  { %s212_s22 = scalar_lea.vmem %s122_s21, 128  ;;  %p217_p1 = scmp.lt.s32.totalorder %s122_s21, %s122_s21 }
   0xc   :  { %190 = vmatpush3.bf16.msra.mxu0 %v189_v10  ;;  %p213_p0 = scmp.ne.s32.totalorder %s122_s21, %s212_s22  ;;  %p218_p2 = scmp.lt.s32.totalorder %s212_s22, %s212_s22 }
   0xd   :  { %191 = vmatprep.subr.bf16.mxu0 %v236_v3 }
   0xe   :  { %p219_p3 = por %p218_p2, %p217_p1 }
  0x10   :  { %193 = vmatpush3.bf16.msra.mxu0 %v192_v13  ;;  %p220_p4 = pnand %p219_p3, %p213_p0 }
  0x11   :  { %194 = vmatprep.subr.bf16.mxu0 %v236_v3 }
  0x14   :  { %196 = vmatpush3.bf16.msra.mxu0 %v195_v16 }
  0x15   :  { %197 = vmatprep.subr.bf16.mxu0 %v236_v3 }
  0x18   :  { %199 = vmatpush3.bf16.msra.mxu0 %v198_v19 }
  0x19   :  { %200 = vmatprep.subr.bf16.mxu0 %v236_v3 }
  0x1c   :  { %202 = vmatpush3.bf16.msra.mxu0 %v201_v22 }
  0x1d   :  { %203 = vmatprep.subr.bf16.mxu0 %v236_v3 }
  0x20   :  { %205 = vmatpush3.bf16.msra.mxu0 %v204_v25 }
  0x23   :  { %180 = vmatmul.mubr.f32.vlgmr.msra.gmra.mrb[0].mxu0 %v15_v26 }
  0xf6   :  { %v105_v28 = vpop.f32.mrb[0].mxu0 }
  0xf7   :  { %v106_v29 = vadd.f32 %v129_v27, %v105_v28  ;;  %v181_v30 = vpop.f32.mrb[1].mxu0 }
  0xf9   :  { %v110_v31 = vmul.f32 0.70710677, %v106_v29  ;;  %v109_v33 = vmul.f32 0.5, %v106_v29 }
  0xfb   :  { %210 = verf.f32 %v110_v31 }
 0x105   :  { %v211_v32 = vpop.eup %210 }
 0x106   :  { %v112_v34 = vadd.f32 1.0, %v211_v32 }
 0x108   :  { %v113_v35 = vmul.f32 %v112_v34, %v109_v33 }
 0x10a   :  { %114 = vst [vmem:[#allocation3] sm:$0xff] %v113_v35 }
 0x10b   :  { %223 = shalt.err (!%p220_p4)
}
 0x10c   :  { %s224_s23 = scalar_lea.hbm %s329_s3, 128 }
 0x10d   :  { %p225_p5 = scmp.ne.s32.totalorder %s329_s3, %s224_s23  ;;  %p228_p6 = scmp.lt.u32.totalorder %s224_s23, %s329_s3 }
 0x10f   :  { %p230_p7 = pnand %p228_p6, %p225_p5 }
 0x111   :  { %233 = shalt.err (!%p230_p7)
}
 0x112   :  { %124 = dma.vmem_to_hbm [thread:$0]  %s122_s21, 128, %s329_s3, [#allocation4]  }
 0x113   :  { %234 = dma.done.wait [#allocation4], 128  }
 0x114   :  { %235 = vsyncadd [#allocation4], 4294967168 }
 0x115   :  { %128 = vsyncpa [#allocation4], 1 }

</bundles_post_ra>
